<compile_context>
chip_gen: v6e
topology: v6e:2x2x1
jax: 0.10.0
libtpu: 0.0.40
codegen_flags: <defaults>
</compile_context>

<pallas_src>
import functools

import jax
import jax.numpy as jnp
from jax.experimental import pallas as pl
from jax.experimental.pallas import tpu as pltpu


_WAVE = 16                                # row DMAs issued per wave
_LOOKAHEAD = 2                            # waves kept in flight ahead of drain
_OUT_VMEM_BUDGET = 8 * 1024 * 1024        # double-buffered output block budget
_ONEHOT_VMEM_BUDGET = 4 * 1024 * 1024     # one-hot intermediate budget
_FAST_PATH_TABLE_BYTES = 2 * 1024 * 1024  # table size cap for the VMEM path
_FAST_PATH_MAX_VOCAB = 4096               # bounds one-hot width
_MAX_IDS_PER_CALL = 64 * 1024             # scalar-prefetch (SMEM) safety cap
_VMEM_LIMIT_BYTES = 32 * 1024 * 1024      # safe on v5e/v6e/v7x


def _round_up(x, m):
    return ((x + m - 1) // m) * m


# --------------------------------------------------------------------------
# Path 1: small table resident in VMEM, one-hot MXU gather.
# --------------------------------------------------------------------------
def _onehot_gather_kernel(ids_ref, table_ref, out_ref):
    # ids_ref  : (tb, 1) int32 VMEM  -- this block's token ids
    # table_ref: (V, D)        VMEM  -- full table (constant block index ->
    #                                   fetched once, stays resident)
    # out_ref  : (tb, D)       VMEM  -- pipelined output block
    v = table_ref.shape[0]
    tb = out_ref.shape[0]
    ids = ids_ref[...]                                      # (tb, 1)
    cols = jax.lax.broadcasted_iota(jnp.int32, (tb, v), 1)  # (tb, V)
    onehot = (cols == ids).astype(jnp.float32)
    out_ref[...] = jax.lax.dot_general(
        onehot,
        table_ref[...].astype(jnp.float32),
        dimension_numbers=(((1,), (0,)), ((), ())),
        preferred_element_type=jnp.float32,
    ).astype(out_ref.dtype)


def _gather_small_table(flat_ids, table, token_block):
    v, d = table.shape
    n = flat_ids.shape[0]
    itemsize = jnp.dtype(table.dtype).itemsize
    tb = min(token_block,
             max(8, _OUT_VMEM_BUDGET // (2 * d * itemsize)),
             max(8, _ONEHOT_VMEM_BUDGET // (4 * v)),
             _round_up(n, 8))
    tb = max(8, (tb // 8) * 8)
    n_pad = _round_up(n, tb)
    ids = flat_ids
    if n_pad != n:
        # Padded rows gather row 0; sliced off below.
        ids = jnp.pad(ids, (0, n_pad - n))
    ids2d = ids.reshape(n_pad, 1)

    out = pl.pallas_call(
        _onehot_gather_kernel,
        out_shape=jax.ShapeDtypeStruct((n_pad, d), table.dtype),
        grid_spec=pltpu.PrefetchScalarGridSpec(
            num_scalar_prefetch=0,
            grid=(n_pad // tb,),
            in_specs=[
                pl.BlockSpec((tb, 1), lambda i: (i, 0)),   # ids block
                pl.BlockSpec((v, d), lambda i: (0, 0)),    # whole table, resident
            ],
            out_specs=pl.BlockSpec((tb, d), lambda i: (i, 0)),
        ),
        compiler_params=pltpu.CompilerParams(
            dimension_semantics=("arbitrary",),
            vmem_limit_bytes=_VMEM_LIMIT_BYTES,
        ),
    )(ids2d, table)
    return out[:n]


# --------------------------------------------------------------------------
# Path 2: table in HBM, per-row DMA gather straight into the output block.
# --------------------------------------------------------------------------
def _dma_gather_kernel(ids_ref, table_hbm, out_ref, sems, *, n_valid):
    # ids_ref  : (n_pad,) int32 SMEM (scalar prefetch) -- all chunk token ids
    # table_hbm: (V, D) HBM (pl.ANY)                   -- never copied wholesale
    # out_ref  : (tb, D) pipelined VMEM output block   -- DMA destination
    # sems     : (_LOOKAHEAD + 1, _WAVE) DMA semaphores
    # n_valid  : static count of real (non-padded) tokens in this chunk
    tb = out_ref.shape[0]
    n_waves = tb // _WAVE
    n_slots = _LOOKAHEAD + 1
    base = pl.program_id(0) * tb
    all_full = (n_valid % tb) == 0          # static: skip guards if no padding

    def row_copy(w, slot, j, start):
        t = w * _WAVE + j

        def one(t=t, j=j):
            row = ids_ref[base + t]
            cp = pltpu.make_async_copy(
                table_hbm.at[row], out_ref.at[t], sems.at[slot, j])
            if start:
                cp.start()
            else:
                cp.wait()

        if all_full:
            one()
        else:
            pl.when(base + t < n_valid)(one)

    def issue_wave(w):
        slot = w % n_slots
        for j in range(_WAVE):
            row_copy(w, slot, j, start=True)

    def drain_wave(w):
        slot = w % n_slots
        for j in range(_WAVE):
            row_copy(w, slot, j, start=False)

    # Prime the lookahead window, then: issue wave w+LOOKAHEAD, drain wave w.
    for w in range(min(_LOOKAHEAD, n_waves)):
        issue_wave(w)

    def step(w, carry):
        if n_waves > _LOOKAHEAD:            # static: lookahead issue needed?
            @pl.when(w + _LOOKAHEAD < n_waves)
            def _():
                issue_wave(w + _LOOKAHEAD)
        drain_wave(w)
        return carry

    jax.lax.fori_loop(0, n_waves, step, 0)


def _gather_dma(flat_ids, table, token_block):
    v, d = table.shape
    n = flat_ids.shape[0]
    itemsize = jnp.dtype(table.dtype).itemsize
    tb = min(token_block,
             max(_WAVE, _OUT_VMEM_BUDGET // (2 * d * itemsize)),
             _round_up(n, _WAVE))
    tb = max(_WAVE, (tb // _WAVE) * _WAVE)
    n_pad = _round_up(n, tb)
    ids = flat_ids
    if n_pad != n:
        # Padded tail is guarded in-kernel: no DMA is ever issued for it.
        ids = jnp.pad(ids, (0, n_pad - n))

    kernel = functools.partial(_dma_gather_kernel, n_valid=n)

    out = pl.pallas_call(
        kernel,
        out_shape=jax.ShapeDtypeStruct((n_pad, d), table.dtype),
        grid_spec=pltpu.PrefetchScalarGridSpec(
            num_scalar_prefetch=1,                           # ids -> SMEM
            grid=(n_pad // tb,),
            in_specs=[pl.BlockSpec(memory_space=pl.ANY)],    # table stays in HBM
            out_specs=pl.BlockSpec((tb, d), lambda i, ids: (i, 0)),
            scratch_shapes=[pltpu.SemaphoreType.DMA((_LOOKAHEAD + 1, _WAVE))],
        ),
        compiler_params=pltpu.CompilerParams(
            dimension_semantics=("parallel",),
            vmem_limit_bytes=_VMEM_LIMIT_BYTES,
        ),
    )(ids, table)
    return out[:n]


# --------------------------------------------------------------------------
# Public wrapper == WordEmbedding.forward
# --------------------------------------------------------------------------
def word_embedding(indices, table, *, token_block=256, force_dma_gather=False):
    """Pallas equivalent of nn.Embedding(vocab, dim)(indices).

    indices: integer array of any shape (e.g. (batch, seq))
    table  : (vocab_size, embedding_dim) float table
    returns: indices.shape + (embedding_dim,) in table.dtype
    """
    v, d = table.shape
    orig_shape = tuple(indices.shape)
    flat = indices.reshape(-1).astype(jnp.int32)
    n = flat.shape[0]
    if n == 0:
        return jnp.zeros(orig_shape + (d,), dtype=table.dtype)

    table_bytes = v * d * jnp.dtype(table.dtype).itemsize
    use_fast = (not force_dma_gather
                and table_bytes <= _FAST_PATH_TABLE_BYTES
                and v <= _FAST_PATH_MAX_VOCAB)

    if use_fast:
        out = _gather_small_table(flat, table, token_block)
    elif n <= _MAX_IDS_PER_CALL:
        out = _gather_dma(flat, table, token_block)
    else:
        # Bound the SMEM scalar-prefetch footprint: process ids in chunks.
        parts = [_gather_dma(flat[s:s + _MAX_IDS_PER_CALL], table, token_block)
                 for s in range(0, n, _MAX_IDS_PER_CALL)]
        out = jnp.concatenate(parts, axis=0)
    return out.reshape(orig_shape + (d,))


if __name__ == "__main__":
    # Small shapes consistent with the module's forward.
    vocab_size, embedding_dim = 64, 128
    batch, seq = 2, 8

    key = jax.random.PRNGKey(0)
    k_idx, k_tab = jax.random.split(key)

    # nn.Embedding default init is N(0, 1).
    table = jax.random.normal(k_tab, (vocab_size, embedding_dim), dtype=jnp.float32)
    indices = jax.random.randint(k_idx, (batch, seq), 0, vocab_size, dtype=jnp.int32)

    ref = jnp.take(table, indices, axis=0)

    # Path 1: small-table fast path (default dispatch for this config).
    out_fast = jax.block_until_ready(word_embedding(indices, table))
    assert out_fast.shape == (batch, seq, embedding_dim)
    # One-hot MXU gather may round through bf16 passes depending on matmul
    # precision; 2e-2 still cleanly distinguishes right vs wrong rows (~N(0,1)).
    assert bool(jnp.allclose(out_fast, ref, rtol=0.0, atol=2e-2))

    # Path 2: HBM-resident DMA-gather path (large-vocab path) -- exact copy.
    out_dma = jax.block_until_ready(
        word_embedding(indices, table, force_dma_gather=True))
    assert out_dma.shape == (batch, seq, embedding_dim)
    assert bool(jnp.array_equal(out_dma, ref))

    # Ragged token count exercises the padded-tail guards on the DMA path.
    idx_odd = indices.reshape(-1)[:13].reshape(1, 13)
    out_odd = jax.block_until_ready(
        word_embedding(idx_odd, table, force_dma_gather=True))
    assert bool(jnp.array_equal(out_odd, jnp.take(table, idx_odd, axis=0)))

    print("KERNEL_OK")
</pallas_src>

<mosaic_0001>
module attributes {stable_mosaic.version = 11 : i64} {
  func.func @_onehot_gather_kernel(%arg0: i32, %arg1: memref<16x1xi32, #tpu.memory_space<vmem>>, %arg2: memref<64x128xf32, #tpu.memory_space<vmem>>, %arg3: memref<16x128xf32, #tpu.memory_space<vmem>>) attributes {dimension_semantics = [#tpu.dimension_semantics<arbitrary>], iteration_bounds = array<i64: 1>, scalar_prefetch = 0 : i64, scratch_operands = 0 : i64, tpu.core_type = #tpu.core_type<tc>, window_params = [{transform_indices = @transform_0, window_bounds = array<i64: 16, 1>}, {pipeline_mode = #tpu.pipeline_mode<synchronous>, transform_indices = @transform_1, window_bounds = array<i64: 64, 128>}, {transform_indices = @transform_2, window_bounds = array<i64: 16, 128>}]} {
    %c0 = arith.constant 0 : index
    %c0_0 = arith.constant 0 : index
    %0 = vector.load %arg1[%c0, %c0_0] : memref<16x1xi32, #tpu.memory_space<vmem>>, vector<16x1xi32>
    %1 = tpu.iota {dimensions = array<i32: 1>} : vector<16x64xi32>
    %2 = vector.broadcast %0 : vector<16x1xi32> to vector<16x64xi32>
    %3 = arith.cmpi eq, %1, %2 : vector<16x64xi32>
    %4 = arith.extui %3 : vector<16x64xi1> to vector<16x64xi32>
    %5 = arith.sitofp %4 : vector<16x64xi32> to vector<16x64xf32>
    %c0_1 = arith.constant 0 : index
    %c0_2 = arith.constant 0 : index
    %6 = vector.load %arg2[%c0_1, %c0_2] : memref<64x128xf32, #tpu.memory_space<vmem>>, vector<64x128xf32>
    %cst = arith.constant dense<0.000000e+00> : vector<16x128xf32>
    %7 = tpu.matmul %5, %6, %cst {dimension_numbers = #tpu.dot_dimension_numbers<[1], [0], [0], [1], [0, 0, 1, 1], [], []>} : vector<16x64xf32>, vector<64x128xf32>, vector<16x128xf32> -> vector<16x128xf32>
    %c0_3 = arith.constant 0 : index
    %c0_4 = arith.constant 0 : index
    %8 = vector.load %arg3[%c0_3, %c0_4] : memref<16x128xf32, #tpu.memory_space<vmem>>, vector<16x128xf32>
    tpu.vector_store %arg3[%c0_3, %c0_4], %7 {strides = array<i32>} : memref<16x128xf32, #tpu.memory_space<vmem>>, vector<16x128xf32>,
    return
  }
  func.func @transform_0(%arg0: i32) -> (i32, i32) {
    %c0_i32 = arith.constant 0 : i32
    %c0_i32_0 = arith.constant 0 : i32
    return %arg0, %c0_i32 : i32, i32
  }
  func.func @transform_1(%arg0: i32) -> (i32, i32) {
    %c0_i32 = arith.constant 0 : i32
    %c0_i32_0 = arith.constant 0 : i32
    %c0_i32_1 = arith.constant 0 : i32
    return %c0_i32, %c0_i32_0 : i32, i32
  }
  func.func @transform_2(%arg0: i32) -> (i32, i32) {
    %c0_i32 = arith.constant 0 : i32
    %c0_i32_0 = arith.constant 0 : i32
    return %arg0, %c0_i32 : i32, i32
  }
}

</mosaic_0001>

<bundles_post_ra>
// kernel: tpu_custom_call.1
= control target key start
LH: loop header
LB: loop body
LE: loop exit
PB: predicated region body
PF: predicated region fallthrough
CT: control target
= control target key end

     0   :  { %7 = vsyncpa [#allocation3], 0  ;;  %s274_s0 = inlined_call_operand.vmem [shape: s32[16,1], index: 0, kind: input, shape index: {}]   ;;  %s275_s1 = inlined_call_operand.hbm [shape: f32[64,128], index: 1, kind: input, shape index: {}]   ;;  %s276_s2 = inlined_call_operand.hbm [shape: f32[16,128], index: 2, kind: output, shape index: {}]  }
   0x1   :  { %8 = vsyncpa [#allocation4], 0  ;;  %s235_s9 = smov [#allocation2]  }
   0x2   :  { %s16_s10 = sshll.u32 %s235_s9, 4  ;;  %s17_s10 = int_to_ptr.vmem [resolvable:$true] %s16_s10 }
   0x3   :  { %s199_s11 = scalar_lea.vmem %s17_s10, 1024  ;;  %p204_p1 = scmp.lt.s32.totalorder %s17_s10, %s17_s10 }
   0x4   :  { %p200_p0 = scmp.ne.s32.totalorder %s17_s10, %s199_s11  ;;  %p205_p2 = scmp.lt.s32.totalorder %s199_s11, %s199_s11 }
   0x6   :  { %p206_p3 = por %p205_p2, %p204_p1 }
   0x8   :  { %p207_p4 = pnand %p206_p3, %p200_p0 }
   0xa   :  { %210 = shalt.err (!%p207_p4)
}
   0xb   :  { %s236_s12 = smov 128   ;;  %s237_s13 = smov 8  }
   0xc   :  { %22 = dma.hbm_to_vmem [thread:$0]  %s275_s1, 1024, %s17_s10, [#allocation3], %s236_s12, %s236_s12, %s237_s13  }
   0xd   :  { %231 = dma.done.wait [#allocation3], 1024  }
   0xe   :  { %232 = vsyncadd [#allocation3], 4294966272  ;;  %v238_v0 = vmov 0   ;;  %v26_v1 = vld [vmem:[%s274_s0] sm:$0xff]  ;;  %v49_v2 = vld [vmem:[#allocation2 + $0x38] sm:$0xff]  ;;  %v28_v11 = vlaneseq  ;;  %vm50_vm0 = vcmask 523264  }
   0xf   :  { %190 = vset.pattern.permute.xlu0 %v238_v0  ;;  %165 = vmatprep.subr.mxu0 %v49_v2  ;;  %v48_v3 = vld [vmem:[#allocation2 + $0x30] sm:$0xff]  ;;  %v27_v4 = vld [vmem:[%s274_s0 + $0x8] sm:$0xff]  ;;  %v46_v6 = vld [vmem:[#allocation2 + $0x20] sm:$0xff]  ;;  %v239_v14 = vmov 0.0   ;;  %s240_s0 = smov [#allocation5]  }
  0x10   :  { %31 = vperm.xlu0 %190, %v26_v1   ;;  %166 = vmatpush3.msra.mxu0 %v49_v2  ;;  %v47_v5 = vld [vmem:[#allocation2 + $0x28] sm:$0xff]  ;;  %v45_v7 = vld [vmem:[#allocation2 + $0x18] sm:$0xff]  ;;  %v44_v8 = vld [vmem:[#allocation2 + $0x10] sm:$0xff]  ;;  %v29_v12 = vand.u32 127, %v28_v11  ;;  %s139_s1 = sshll.u32 %s240_s0, 4  ;;  %s140_s1 = int_to_ptr.vmem [resolvable:$true] %s139_s1 }
  0x11   :  { %167 = vmatprep.subr.mxu0 %v48_v3  ;;  %v43_v9 = vld [vmem:[#allocation2 + $0x8] sm:$0xff]  ;;  %v42_v10 = vld [vmem:[#allocation2] sm:$0xff]  ;;  %s211_s20 = scalar_lea.vmem %s140_s1, 256  ;;  %p216_p6 = scmp.lt.s32.totalorder %s140_s1, %s140_s1 }
  0x12   :  { %168 = vmatpush3.msra.mxu0 %v48_v3  ;;  %p212_p5 = scmp.ne.s32.totalorder %s140_s1, %s211_s20  ;;  %p217_p7 = scmp.lt.s32.totalorder %s211_s20, %s211_s20 }
  0x13   :  { %169 = vmatprep.subr.mxu0 %v47_v5 }
  0x14   :  { %34 = vperm.xlu0 %190, %v27_v4   ;;  %170 = vmatpush3.msra.mxu0 %v47_v5  ;;  %p218_p8 = por %p217_p7, %p216_p6 }
  0x15   :  { %171 = vmatprep.subr.mxu0 %v46_v6 }
  0x16   :  { %172 = vmatpush3.msra.mxu0 %v46_v6  ;;  %p219_p9 = pnand %p218_p8, %p212_p5 }
  0x17   :  { %173 = vmatprep.subr.mxu0 %v45_v7 }
  0x18   :  { %174 = vmatpush3.msra.mxu0 %v45_v7 }
  0x19   :  { %175 = vmatprep.subr.mxu0 %v44_v8 }
  0x1a   :  { %176 = vmatpush3.msra.mxu0 %v44_v8 }
  0x1b   :  { %177 = vmatprep.subr.mxu0 %v43_v9 }
  0x1c   :  { %178 = vmatpush3.msra.mxu0 %v43_v9 }
  0x1d   :  { %179 = vmatprep.subr.mxu0 %v42_v10 }
  0x1e   :  { %180 = vmatpush3.msra.mxu0 %v42_v10 }
  0x8b   :  { %v32_v13 = vpop.permute.xlu0 %31 }
  0x8c   :  { %vm36_vm1 = vcmp.eq.s32.totalorder %v29_v12, %v32_v13 }
  0x8d   :  { %v151_v15 = vsel %vm36_vm1, 1.0, %v239_v14 }
  0x8e   :  { %181 = vmatprep.mubr.msk.f32.mxu0 %vm50_vm0, %v151_v15 }
  0x8f   :  { %v35_v16 = vpop.permute.xlu0 %34 }
  0x90   :  { %vm37_vm2 = vcmp.eq.s32.totalorder %v29_v12, %v35_v16 }
  0x91   :  { %v152_v17 = vsel %vm37_vm2, 1.0, %v239_v14 }
  0x92   :  { %182 = vmatmul.mubr.msk.f32.vlgmr.msra.gmra.mxu0 %vm50_vm0, %v152_v17 }
 0x152   :  { %v183_v18 = vpop.f32.mrf.mxu0 }
 0x153   :  { %133 = vst [vmem:[#allocation5 + $0x8] sm:$0xff] %v183_v18 }
 0x154   :  { %v123_v19 = vpop.f32.mrf.mxu0 }
 0x155   :  { %132 = vst [vmem:[#allocation5] sm:$0xff] %v123_v19 }
 0x156   :  { %222 = shalt.err (!%p219_p9)
}
 0x157   :  { %145 = dma.vmem_to_hbm [thread:$0]  %s140_s1, 256, %s276_s2, [#allocation4], %s236_s12, %s236_s12, %s237_s13  }
 0x158   :  { %233 = dma.done.wait [#allocation4], 256  }
 0x159   :  { %234 = vsyncadd [#allocation4], 4294967040 }
 0x15a   :  { %149 = vsyncpa [#allocation3], 1 }
 0x15b   :  { %150 = vsyncpa [#allocation4], 1 }

</bundles_post_ra>
